<compile_context>
chip_gen: v6e
topology: v6e:2x2x1
jax: 0.10.0
libtpu: 0.0.40
codegen_flags: <defaults>
</compile_context>

<pallas_src>
import math
import functools

import jax
import jax.numpy as jnp
from jax.experimental import pallas as pl
from jax.experimental.pallas import tpu as pltpu


def _round_up(v, m):
    return -(-v // m) * m


def _ffn_kernel(x_ref, w1_ref, b1_ref, w2_ref, b2_ref, o_ref, acc_ref,
                *, cast_bf16):
    # x_ref:  (tm, dim_p)      resident across the hidden axis
    # w1_ref: (dim_p, tk)      streamed per hidden tile
    # b1_ref: (1, tk)          streamed per hidden tile
    # w2_ref: (tk, dim_p)      streamed per hidden tile
    # b2_ref: (1, dim_p)       constant
    # o_ref:  (tm, dim_p)      written once at the last hidden tile
    # acc_ref:(tm, dim_p) f32  scratch accumulator
    k = pl.program_id(1)

    @pl.when(k == 0)
    def _():
        acc_ref[...] = jnp.zeros_like(acc_ref)

    xv = x_ref[...]
    w1 = w1_ref[...]
    w2 = w2_ref[...]
    if cast_bf16:
        xv = xv.astype(jnp.bfloat16)
        w1 = w1.astype(jnp.bfloat16)
        w2 = w2.astype(jnp.bfloat16)

    # First linear for this hidden slice: native/bf16 operands, f32 accumulation.
    h = jnp.dot(xv, w1, preferred_element_type=jnp.float32)
    h = h + b1_ref[...].astype(jnp.float32)

    # Exact (erf-based) GELU, matching torch.nn.GELU() default.
    h = 0.5 * h * (1.0 + jax.lax.erf(h * (1.0 / math.sqrt(2.0))))

    # Dropout(p=0.0) == identity.

    # Second linear: accumulate this hidden slice's contribution in f32.
    acc_ref[...] += jnp.dot(h.astype(w2.dtype), w2,
                            preferred_element_type=jnp.float32)

    @pl.when(k == pl.num_programs(1) - 1)
    def _():
        out = acc_ref[...] + b2_ref[...].astype(jnp.float32)
        # Dropout(p=0.0) == identity.
        o_ref[...] = out.astype(o_ref.dtype)


def prepare_params(w1, b1, w2, b2, *, tk=512):
    """One-time padding of weights/biases to lane-dense, tile-aligned shapes.

    Done once at init so the forward pass does not re-copy the weights in HBM
    on every call. Padding is mathematically inert (zero rows/cols).
    """
    dim, hidden = w1.shape
    dim_p = _round_up(dim, 128)
    tk_eff = min(tk, _round_up(hidden, 128))
    hid_p = _round_up(hidden, tk_eff)

    w1_p = jnp.pad(w1, ((0, dim_p - dim), (0, hid_p - hidden)))
    b1_p = jnp.pad(b1, (0, hid_p - hidden)).reshape(1, hid_p)
    w2_p = jnp.pad(w2, ((0, hid_p - hidden), (0, dim_p - dim)))
    b2_p = jnp.pad(b2, (0, dim_p - dim)).reshape(1, dim_p)
    return w1_p, b1_p, w2_p, b2_p


@functools.partial(jax.jit, static_argnames=("tm", "tk", "cast_to_bf16"))
def feed_forward(x, w1_p, b1_p, w2_p, b2_p, *, tm=256, tk=512,
                 cast_to_bf16=False):
    """x: (B, N, dim). Weights pre-padded via prepare_params. Returns (B, N, dim)."""
    B, N, dim = x.shape
    M = B * N
    dim_p, hid_p = w1_p.shape

    # Hidden tile: same rule as prepare_params so it divides hid_p exactly.
    tk_eff = min(tk, hid_p)
    assert hid_p % tk_eff == 0, "weights were padded with a different tk"

    # Row tile: bf16 activations pack 16 rows per sublane group, f32 pack 8.
    row_mult = 16 if jnp.dtype(x.dtype).itemsize < 4 else 8
    tm_eff = min(tm, _round_up(M, row_mult))
    M_p = _round_up(M, tm_eff)

    # Pad activations only when actually ragged (avoids a full HBM copy otherwise).
    x2d = x.reshape(M, dim)
    if M_p != M or dim_p != dim:
        x2d = jnp.pad(x2d, ((0, M_p - M), (0, dim_p - dim)))

    # VMEM budget: double-buffered blocks + f32 accumulator, with headroom.
    xsz = jnp.dtype(x.dtype).itemsize
    wsz = jnp.dtype(w1_p.dtype).itemsize
    est = (2 * tm_eff * dim_p * xsz            # x tile (double-buffered)
           + 2 * dim_p * tk_eff * wsz          # W1 tile
           + 2 * tk_eff * wsz                  # b1 tile
           + 2 * tk_eff * dim_p * wsz          # W2 tile
           + 2 * dim_p * wsz                   # b2
           + 2 * tm_eff * dim_p * xsz          # out tile
           + tm_eff * dim_p * 4)               # f32 accumulator scratch
    vmem_limit = min(max(int(est * 1.5) + (4 << 20), 32 << 20), 56 << 20)

    kernel = functools.partial(_ffn_kernel, cast_bf16=cast_to_bf16)

    out2d = pl.pallas_call(
        kernel,
        out_shape=jax.ShapeDtypeStruct((M_p, dim_p), x.dtype),
        grid_spec=pltpu.PrefetchScalarGridSpec(
            num_scalar_prefetch=0,
            grid=(M_p // tm_eff, hid_p // tk_eff),
            in_specs=[
                pl.BlockSpec((tm_eff, dim_p), lambda i, k: (i, 0)),   # x (resident over k)
                pl.BlockSpec((dim_p, tk_eff), lambda i, k: (0, k)),   # W1 slice
                pl.BlockSpec((1, tk_eff), lambda i, k: (0, k)),       # b1 slice
                pl.BlockSpec((tk_eff, dim_p), lambda i, k: (k, 0)),   # W2 slice
                pl.BlockSpec((1, dim_p), lambda i, k: (0, 0)),        # b2
            ],
            out_specs=pl.BlockSpec((tm_eff, dim_p), lambda i, k: (i, 0)),
            scratch_shapes=[pltpu.VMEM((tm_eff, dim_p), jnp.float32)],
        ),
        compiler_params=pltpu.CompilerParams(
            dimension_semantics=("parallel", "arbitrary"),
            vmem_limit_bytes=vmem_limit,
        ),
    )(x2d, w1_p, b1_p, w2_p, b2_p)

    if M_p != M or dim_p != dim:
        out2d = out2d[:M, :dim]
    return out2d.reshape(B, N, dim)


def init_params(key, dim, hidden_dim, dtype=jnp.float32):
    """Deterministic init mimicking torch.nn.Linear defaults (U[-1/sqrt(fan_in), 1/sqrt(fan_in)])."""
    k1, k2, k3, k4 = jax.random.split(key, 4)
    bound1 = 1.0 / math.sqrt(dim)
    bound2 = 1.0 / math.sqrt(hidden_dim)
    w1 = jax.random.uniform(k1, (dim, hidden_dim), dtype, -bound1, bound1)
    b1 = jax.random.uniform(k2, (hidden_dim,), dtype, -bound1, bound1)
    w2 = jax.random.uniform(k3, (hidden_dim, dim), dtype, -bound2, bound2)
    b2 = jax.random.uniform(k4, (dim,), dtype, -bound2, bound2)
    return w1, b1, w2, b2


def _reference(x, w1, b1, w2, b2):
    h = jnp.einsum("bnd,dh->bnh", x, w1) + b1
    h = 0.5 * h * (1.0 + jax.lax.erf(h / jnp.sqrt(2.0)))
    return jnp.einsum("bnh,hd->bnd", h, w2) + b2


if __name__ == "__main__":
    B, N, dim, hidden_dim = 2, 8, 32, 64

    key = jax.random.PRNGKey(0)
    kx, kp = jax.random.split(key)
    x = jax.random.normal(kx, (B, N, dim), jnp.float32)
    w1, b1, w2, b2 = init_params(kp, dim, hidden_dim)

    # One-time weight padding (hoisted out of the forward pass).
    w1_p, b1_p, w2_p, b2_p = prepare_params(w1, b1, w2, b2)

    out = feed_forward(x, w1_p, b1_p, w2_p, b2_p)
    out = jax.block_until_ready(out)

    ref = _reference(x, w1, b1, w2, b2)
    assert out.shape == (B, N, dim)
    assert jnp.allclose(out, ref, atol=1e-5, rtol=1e-5), "mismatch vs reference"

    print("KERNEL_OK")
</pallas_src>

<mosaic_0001>
module attributes {stable_mosaic.version = 11 : i64} {
  func.func @_ffn_kernel(%arg0: i32, %arg1: i32, %arg2: memref<16x128xf32, #tpu.memory_space<vmem>>, %arg3: memref<128x128xf32, #tpu.memory_space<vmem>>, %arg4: memref<1x128xf32, #tpu.memory_space<vmem>>, %arg5: memref<128x128xf32, #tpu.memory_space<vmem>>, %arg6: memref<1x128xf32, #tpu.memory_space<vmem>>, %arg7: memref<16x128xf32, #tpu.memory_space<vmem>>, %arg8: memref<16x128xf32, #tpu.memory_space<vmem>>) attributes {dimension_semantics = [#tpu.dimension_semantics<parallel>, #tpu.dimension_semantics<arbitrary>], iteration_bounds = array<i64: 1, 1>, scalar_prefetch = 0 : i64, scratch_operands = 1 : i64, tpu.core_type = #tpu.core_type<tc>, window_params = [{transform_indices = @transform_0, window_bounds = array<i64: 16, 128>}, {transform_indices = @transform_1, window_bounds = array<i64: 128, 128>}, {transform_indices = @transform_2, window_bounds = array<i64: 1, 128>}, {transform_indices = @transform_3, window_bounds = array<i64: 128, 128>}, {pipeline_mode = #tpu.pipeline_mode<synchronous>, transform_indices = @transform_4, window_bounds = array<i64: 1, 128>}, {transform_indices = @transform_5, window_bounds = array<i64: 16, 128>}]} {
    %c0_i32 = arith.constant 0 : i32
    %0 = arith.cmpi eq, %arg1, %c0_i32 : i32
    %1 = arith.extui %0 : i1 to i32
    %c0_i32_0 = arith.constant 0 : i32
    %2 = arith.cmpi ne, %1, %c0_i32_0 : i32
    scf.if %2 {
      %cst_18 = arith.constant 0.000000e+00 : f32
      %25 = vector.broadcast %cst_18 : f32 to vector<16x128xf32>
      %c0_19 = arith.constant 0 : index
      %c0_20 = arith.constant 0 : index
      %26 = vector.load %arg8[%c0_19, %c0_20] : memref<16x128xf32, #tpu.memory_space<vmem>>, vector<16x128xf32>
      tpu.vector_store %arg8[%c0_19, %c0_20], %25 {strides = array<i32>} : memref<16x128xf32, #tpu.memory_space<vmem>>, vector<16x128xf32>,
    } else {
    }
    %c0 = arith.constant 0 : index
    %c0_1 = arith.constant 0 : index
    %3 = vector.load %arg2[%c0, %c0_1] : memref<16x128xf32, #tpu.memory_space<vmem>>, vector<16x128xf32>
    %c0_2 = arith.constant 0 : index
    %c0_3 = arith.constant 0 : index
    %4 = vector.load %arg3[%c0_2, %c0_3] : memref<128x128xf32, #tpu.memory_space<vmem>>, vector<128x128xf32>
    %c0_4 = arith.constant 0 : index
    %c0_5 = arith.constant 0 : index
    %5 = vector.load %arg5[%c0_4, %c0_5] : memref<128x128xf32, #tpu.memory_space<vmem>>, vector<128x128xf32>
    %cst = arith.constant dense<0.000000e+00> : vector<16x128xf32>
    %6 = tpu.matmul %3, %4, %cst {dimension_numbers = #tpu.dot_dimension_numbers<[1], [0], [0], [1], [0, 0, 1, 1], [], []>} : vector<16x128xf32>, vector<128x128xf32>, vector<16x128xf32> -> vector<16x128xf32>
    %c0_6 = arith.constant 0 : index
    %c0_7 = arith.constant 0 : index
    %7 = vector.load %arg4[%c0_6, %c0_7] : memref<1x128xf32, #tpu.memory_space<vmem>>, vector<1x128xf32>
    %8 = vector.broadcast %7 : vector<1x128xf32> to vector<16x128xf32>
    %9 = arith.addf %6, %8 : vector<16x128xf32>
    %cst_8 = arith.constant 5.000000e-01 : f32
    %10 = vector.broadcast %cst_8 : f32 to vector<16x128xf32>
    %11 = arith.mulf %10, %9 : vector<16x128xf32>
    %cst_9 = arith.constant 0.707106769 : f32
    %12 = vector.broadcast %cst_9 : f32 to vector<16x128xf32>
    %13 = arith.mulf %9, %12 : vector<16x128xf32>
    %14 = math.erf %13 : vector<16x128xf32>
    %cst_10 = arith.constant 1.000000e+00 : f32
    %15 = vector.broadcast %cst_10 : f32 to vector<16x128xf32>
    %16 = arith.addf %15, %14 : vector<16x128xf32>
    %17 = arith.mulf %11, %16 : vector<16x128xf32>
    %c0_11 = arith.constant 0 : index
    %c0_12 = arith.constant 0 : index
    %18 = vector.load %arg8[%c0_11, %c0_12] : memref<16x128xf32, #tpu.memory_space<vmem>>, vector<16x128xf32>
    %cst_13 = arith.constant dense<0.000000e+00> : vector<16x128xf32>
    %19 = tpu.matmul %17, %5, %cst_13 {dimension_numbers = #tpu.dot_dimension_numbers<[1], [0], [0], [1], [0, 0, 1, 1], [], []>} : vector<16x128xf32>, vector<128x128xf32>, vector<16x128xf32> -> vector<16x128xf32>
    %20 = arith.addf %18, %19 : vector<16x128xf32>
    %c0_14 = arith.constant 0 : index
    %c0_15 = arith.constant 0 : index
    %21 = vector.load %arg8[%c0_14, %c0_15] : memref<16x128xf32, #tpu.memory_space<vmem>>, vector<16x128xf32>
    tpu.vector_store %arg8[%c0_14, %c0_15], %20 {strides = array<i32>} : memref<16x128xf32, #tpu.memory_space<vmem>>, vector<16x128xf32>,
    %c0_i32_16 = arith.constant 0 : i32
    %22 = arith.cmpi eq, %arg1, %c0_i32_16 : i32
    %23 = arith.extui %22 : i1 to i32
    %c0_i32_17 = arith.constant 0 : i32
    %24 = arith.cmpi ne, %23, %c0_i32_17 : i32
    scf.if %24 {
      %c0_18 = arith.constant 0 : index
      %c0_19 = arith.constant 0 : index
      %25 = vector.load %arg8[%c0_18, %c0_19] : memref<16x128xf32, #tpu.memory_space<vmem>>, vector<16x128xf32>
      %c0_20 = arith.constant 0 : index
      %c0_21 = arith.constant 0 : index
      %26 = vector.load %arg6[%c0_20, %c0_21] : memref<1x128xf32, #tpu.memory_space<vmem>>, vector<1x128xf32>
      %27 = vector.broadcast %26 : vector<1x128xf32> to vector<16x128xf32>
      %28 = arith.addf %25, %27 : vector<16x128xf32>
      %c0_22 = arith.constant 0 : index
      %c0_23 = arith.constant 0 : index
      %29 = vector.load %arg7[%c0_22, %c0_23] : memref<16x128xf32, #tpu.memory_space<vmem>>, vector<16x128xf32>
      tpu.vector_store %arg7[%c0_22, %c0_23], %28 {strides = array<i32>} : memref<16x128xf32, #tpu.memory_space<vmem>>, vector<16x128xf32>,
    } else {
    }
    return
  }
  func.func @transform_0(%arg0: i32, %arg1: i32) -> (i32, i32) {
    %c0_i32 = arith.constant 0 : i32
    %c0_i32_0 = arith.constant 0 : i32
    return %arg0, %c0_i32 : i32, i32
  }
  func.func @transform_1(%arg0: i32, %arg1: i32) -> (i32, i32) {
    %c0_i32 = arith.constant 0 : i32
    %c0_i32_0 = arith.constant 0 : i32
    return %c0_i32, %arg1 : i32, i32
  }
  func.func @transform_2(%arg0: i32, %arg1: i32) -> (i32, i32) {
    %c0_i32 = arith.constant 0 : i32
    %c0_i32_0 = arith.constant 0 : i32
    return %c0_i32, %arg1 : i32, i32
  }
  func.func @transform_3(%arg0: i32, %arg1: i32) -> (i32, i32) {
    %c0_i32 = arith.constant 0 : i32
    %c0_i32_0 = arith.constant 0 : i32
    return %arg1, %c0_i32 : i32, i32
  }
  func.func @transform_4(%arg0: i32, %arg1: i32) -> (i32, i32) {
    %c0_i32 = arith.constant 0 : i32
    %c0_i32_0 = arith.constant 0 : i32
    %c0_i32_1 = arith.constant 0 : i32
    return %c0_i32, %c0_i32_0 : i32, i32
  }
  func.func @transform_5(%arg0: i32, %arg1: i32) -> (i32, i32) {
    %c0_i32 = arith.constant 0 : i32
    %c0_i32_0 = arith.constant 0 : i32
    return %arg0, %c0_i32 : i32, i32
  }
}

</mosaic_0001>

<bundles_post_ra>
// kernel: feed_forward.1
= control target key start
LH: loop header
LB: loop body
LE: loop exit
PB: predicated region body
PF: predicated region fallthrough
CT: control target
= control target key end

     0   :  { %10 = vsyncpa [#allocation4], 0  ;;  %s501_s0 = inlined_call_operand.vmem [shape: f32[16,128], index: 0, kind: input, shape index: {}]   ;;  %s502_s1 = inlined_call_operand.hbm [shape: f32[128,128], index: 1, kind: input, shape index: {}]   ;;  %s503_s2 = inlined_call_operand.vmem [shape: f32[1,128], index: 2, kind: input, shape index: {}]   ;;  %s504_s3 = inlined_call_operand.hbm [shape: f32[128,128], index: 3, kind: input, shape index: {}]   ;;  %s505_s4 = inlined_call_operand.vmem [shape: f32[1,128], index: 4, kind: input, shape index: {}]   ;;  %s506_s5 = inlined_call_operand.vmem [shape: f32[16,128], index: 5, kind: output, shape index: {}]  }
   0x1   :  { %11 = vsyncpa [#allocation6], 0  ;;  %s443_s18 = smov [#allocation3]  }
   0x2   :  { %s19_s19 = sshll.u32 %s443_s18, 4  ;;  %s20_s19 = int_to_ptr.vmem [resolvable:$true] %s19_s19 }
   0x3   :  { %s407_s20 = scalar_lea.vmem %s20_s19, 2048  ;;  %p412_p1 = scmp.lt.s32.totalorder %s20_s19, %s20_s19 }
   0x4   :  { %p408_p0 = scmp.ne.s32.totalorder %s20_s19, %s407_s20  ;;  %p413_p2 = scmp.lt.s32.totalorder %s407_s20, %s407_s20 }
   0x6   :  { %p414_p3 = por %p413_p2, %p412_p1 }
   0x8   :  { %p415_p4 = pnand %p414_p3, %p408_p0 }
   0xa   :  { %418 = shalt.err (!%p415_p4)
}
   0xb   :  { %s444_s21 = smov 128   ;;  %s445_s22 = smov 8  }
   0xc   :  { %25 = dma.hbm_to_vmem [thread:$0]  %s502_s1, 2048, %s20_s19, [#allocation4], %s444_s21, %s444_s21, %s445_s22  }
   0xd   :  { %s446_s25 = smov [#allocation5]  }
   0xe   :  { %s33_s26 = sshll.u32 %s446_s25, 4  ;;  %s34_s26 = int_to_ptr.vmem [resolvable:$true] %s33_s26 }
   0xf   :  { %s427_s27 = scalar_lea.vmem %s34_s26, 2048  ;;  %p432_p6 = scmp.lt.s32.totalorder %s34_s26, %s34_s26 }
  0x10   :  { %p428_p5 = scmp.ne.s32.totalorder %s34_s26, %s427_s27  ;;  %p433_p7 = scmp.lt.s32.totalorder %s427_s27, %s427_s27 }
  0x12   :  { %p434_p8 = por %p433_p7, %p432_p6 }
  0x14   :  { %p435_p9 = pnand %p434_p8, %p428_p5 }
  0x16   :  { %438 = shalt.err (!%p435_p9)
}
  0x17   :  { %39 = dma.hbm_to_vmem [thread:$0]  %s504_s3, 2048, %s34_s26, [#allocation6], %s444_s21, %s444_s21, %s445_s22  }
  0x18   :  { %439 = dma.done.wait [#allocation4], 2048  }
  0x19   :  { %440 = vsyncadd [#allocation4], 4294965248 }
  0x1a   :  { %441 = dma.done.wait [#allocation6], 2048  }
  0x1b   :  { %442 = vsyncadd [#allocation6], 4294965248  ;;  %v71_v0 = vld [vmem:[#allocation3 + $0x78] sm:$0xff]  ;;  %v70_v1 = vld [vmem:[#allocation3 + $0x70] sm:$0xff] }
  0x1c   :  { %321 = vmatprep.subr.mxu0 %v71_v0  ;;  %v69_v2 = vld [vmem:[#allocation3 + $0x68] sm:$0xff]  ;;  %v68_v3 = vld [vmem:[#allocation3 + $0x60] sm:$0xff]  ;;  %v67_v5 = vld [vmem:[#allocation3 + $0x58] sm:$0xff] }
  0x1d   :  { %322 = vmatpush3.msra.mxu0 %v71_v0  ;;  %v54_v4 = vld [vmem:[%s501_s0] sm:$0xff]  ;;  %v87_v6 = vld [vmem:[#allocation5 + $0x78] sm:$0xff]  ;;  %v86_v7 = vld [vmem:[#allocation5 + $0x70] sm:$0xff] }
  0x1e   :  { %323 = vmatprep.subr.mxu0 %v70_v1  ;;  %353 = vmatprep.mubr.f32.mxu0 %v54_v4  ;;  %v66_v8 = vld [vmem:[#allocation3 + $0x50] sm:$0xff]  ;;  %v85_v9 = vld [vmem:[#allocation5 + $0x68] sm:$0xff]  ;;  %v64_v11 = vld [vmem:[#allocation3 + $0x40] sm:$0xff] }
  0x1f   :  { %324 = vmatpush3.msra.mxu0 %v70_v1  ;;  %356 = vmatprep.subr.mxu1 %v87_v6  ;;  %v65_v10 = vld [vmem:[#allocation3 + $0x48] sm:$0xff]  ;;  %v63_v12 = vld [vmem:[#allocation3 + $0x38] sm:$0xff]  ;;  %v62_v13 = vld [vmem:[#allocation3 + $0x30] sm:$0xff] }
  0x20   :  { %325 = vmatprep.subr.mxu0 %v69_v2  ;;  %357 = vmatpush3.msra.mxu1 %v87_v6  ;;  %v61_v14 = vld [vmem:[#allocation3 + $0x28] sm:$0xff]  ;;  %v60_v15 = vld [vmem:[#allocation3 + $0x20] sm:$0xff]  ;;  %v59_v16 = vld [vmem:[#allocation3 + $0x18] sm:$0xff] }
  0x21   :  { %326 = vmatpush3.msra.mxu0 %v69_v2  ;;  %358 = vmatprep.subr.mxu1 %v86_v7  ;;  %v58_v17 = vld [vmem:[#allocation3 + $0x10] sm:$0xff]  ;;  %v57_v18 = vld [vmem:[#allocation3 + $0x8] sm:$0xff]  ;;  %v56_v19 = vld [vmem:[#allocation3] sm:$0xff] }
  0x22   :  { %327 = vmatprep.subr.mxu0 %v68_v3  ;;  %359 = vmatpush3.msra.mxu1 %v86_v7  ;;  %v55_v20 = vld [vmem:[%s501_s0 + $0x8] sm:$0xff]  ;;  %v84_v21 = vld [vmem:[#allocation5 + $0x60] sm:$0xff]  ;;  %v83_v22 = vld [vmem:[#allocation5 + $0x58] sm:$0xff] }
  0x23   :  { %328 = vmatpush3.msra.mxu0 %v68_v3  ;;  %360 = vmatprep.subr.mxu1 %v85_v9  ;;  %v82_v23 = vld [vmem:[#allocation5 + $0x50] sm:$0xff]  ;;  %v81_v24 = vld [vmem:[#allocation5 + $0x48] sm:$0xff]  ;;  %v80_v25 = vld [vmem:[#allocation5 + $0x40] sm:$0xff] }
  0x24   :  { %329 = vmatprep.subr.mxu0 %v67_v5  ;;  %361 = vmatpush3.msra.mxu1 %v85_v9  ;;  %v79_v26 = vld [vmem:[#allocation5 + $0x38] sm:$0xff]  ;;  %v78_v27 = vld [vmem:[#allocation5 + $0x30] sm:$0xff]  ;;  %v77_v28 = vld [vmem:[#allocation5 + $0x28] sm:$0xff] }
  0x25   :  { %330 = vmatpush3.msra.mxu0 %v67_v5  ;;  %362 = vmatprep.subr.mxu1 %v84_v21  ;;  %v76_v29 = vld [vmem:[#allocation5 + $0x20] sm:$0xff]  ;;  %v75_v30 = vld [vmem:[#allocation5 + $0x18] sm:$0xff]  ;;  %v74_v31 = vld [vmem:[#allocation5 + $0x10] sm:$0xff] }
  0x26   :  { %331 = vmatprep.subr.mxu0 %v66_v8  ;;  %363 = vmatpush3.msra.mxu1 %v84_v21  ;;  %v73_v32 = vld [vmem:[#allocation5 + $0x8] sm:$0xff]  ;;  %v72_v33 = vld [vmem:[#allocation5] sm:$0xff] }
  0x27   :  { %332 = vmatpush3.msra.mxu0 %v66_v8  ;;  %364 = vmatprep.subr.mxu1 %v83_v22  ;;  %v283_v34 = vld [vmem:[%s503_s2] ss:$0 sm:$0xff] }
  0x28   :  { %333 = vmatprep.subr.mxu0 %v65_v10  ;;  %365 = vmatpush3.msra.mxu1 %v83_v22  ;;  %v284_v49 = vld [vmem:[%s505_s4] ss:$0 sm:$0xff] }
  0x29   :  { %334 = vmatpush3.msra.mxu0 %v65_v10  ;;  %366 = vmatprep.subr.mxu1 %v82_v23 }
  0x2a   :  { %335 = vmatprep.subr.mxu0 %v64_v11  ;;  %367 = vmatpush3.msra.mxu1 %v82_v23 }
  0x2b   :  { %336 = vmatpush3.msra.mxu0 %v64_v11  ;;  %368 = vmatprep.subr.mxu1 %v81_v24 }
  0x2c   :  { %337 = vmatprep.subr.mxu0 %v63_v12  ;;  %369 = vmatpush3.msra.mxu1 %v81_v24 }
  0x2d   :  { %338 = vmatpush3.msra.mxu0 %v63_v12  ;;  %370 = vmatprep.subr.mxu1 %v80_v25 }
  0x2e   :  { %339 = vmatprep.subr.mxu0 %v62_v13  ;;  %371 = vmatpush3.msra.mxu1 %v80_v25 }
  0x2f   :  { %340 = vmatpush3.msra.mxu0 %v62_v13  ;;  %372 = vmatprep.subr.mxu1 %v79_v26 }
  0x30   :  { %341 = vmatprep.subr.mxu0 %v61_v14  ;;  %373 = vmatpush3.msra.mxu1 %v79_v26 }
  0x31   :  { %342 = vmatpush3.msra.mxu0 %v61_v14  ;;  %374 = vmatprep.subr.mxu1 %v78_v27 }
  0x32   :  { %343 = vmatprep.subr.mxu0 %v60_v15  ;;  %375 = vmatpush3.msra.mxu1 %v78_v27 }
  0x33   :  { %344 = vmatpush3.msra.mxu0 %v60_v15  ;;  %376 = vmatprep.subr.mxu1 %v77_v28 }
  0x34   :  { %345 = vmatprep.subr.mxu0 %v59_v16  ;;  %377 = vmatpush3.msra.mxu1 %v77_v28 }
  0x35   :  { %346 = vmatpush3.msra.mxu0 %v59_v16  ;;  %378 = vmatprep.subr.mxu1 %v76_v29 }
  0x36   :  { %347 = vmatprep.subr.mxu0 %v58_v17  ;;  %379 = vmatpush3.msra.mxu1 %v76_v29 }
  0x37   :  { %348 = vmatpush3.msra.mxu0 %v58_v17  ;;  %380 = vmatprep.subr.mxu1 %v75_v30 }
  0x38   :  { %349 = vmatprep.subr.mxu0 %v57_v18  ;;  %381 = vmatpush3.msra.mxu1 %v75_v30 }
  0x39   :  { %350 = vmatpush3.msra.mxu0 %v57_v18  ;;  %382 = vmatprep.subr.mxu1 %v74_v31 }
  0x3a   :  { %351 = vmatprep.subr.mxu0 %v56_v19  ;;  %383 = vmatpush3.msra.mxu1 %v74_v31 }
  0x3b   :  { %352 = vmatpush3.msra.mxu0 %v56_v19  ;;  %384 = vmatprep.subr.mxu1 %v73_v32 }
  0x3c   :  { %354 = vmatmul.mubr.f32.vlgmr.msra.gmra.mxu0 %v55_v20  ;;  %385 = vmatpush3.msra.mxu1 %v73_v32 }
  0x3d   :  { %386 = vmatprep.subr.mxu1 %v72_v33 }
  0x3e   :  { %387 = vmatpush3.msra.mxu1 %v72_v33 }
  0xfc   :  { %v355_v35 = vpop.f32.mrf.mxu0 }
  0xfd   :  { %v167_v36 = vadd.f32 %v355_v35, %v283_v34 }
  0xfe   :  { %v161_v37 = vpop.f32.mrf.mxu0 }
  0xff   :  { %v173_v38 = vmul.f32 0.70710677, %v167_v36  ;;  %v162_v39 = vadd.f32 %v283_v34, %v161_v37  ;;  %v171_v46 = vmul.f32 0.5, %v167_v36 }
 0x101   :  { %395 = verf.f32 %v173_v38  ;;  %v172_v40 = vmul.f32 0.70710677, %v162_v39  ;;  %v170_v44 = vmul.f32 0.5, %v162_v39 }
 0x103   :  { %397 = verf.f32 %v172_v40 }
 0x10e   :  { %v396_v41 = vpop.eup %395 }
 0x10f   :  { %v177_v43 = vadd.f32 1.0, %v396_v41 }
 0x110   :  { %v398_v42 = vpop.eup %397 }
 0x111   :  { %v176_v45 = vadd.f32 1.0, %v398_v42  ;;  %v179_v48 = vmul.f32 %v177_v43, %v171_v46 }
 0x113   :  { %v178_v47 = vmul.f32 %v176_v45, %v170_v44 }
 0x115   :  { %388 = vmatprep.mubr.f32.mxu1 %v178_v47 }
 0x116   :  { %389 = vmatmul.mubr.f32.vlgmr.msra.gmra.mxu1 %v179_v48 }
 0x1d6   :  { %v390_v50 = vpop.f32.mrf.mxu1 }
 0x1d7   :  { %v274_v51 = vadd.f32 %v390_v50, %v284_v49 }
 0x1d8   :  { %v248_v52 = vpop.f32.mrf.mxu1 }
 0x1d9   :  { %276 = vst [vmem:[%s506_s5 + $0x8] sm:$0xff] %v274_v51  ;;  %v273_v53 = vadd.f32 %v284_v49, %v248_v52 }
 0x1db   :  { %275 = vst [vmem:[%s506_s5] sm:$0xff] %v273_v53 }
 0x1dc   :  { %281 = vsyncpa [#allocation4], 1 }
 0x1dd   :  { %282 = vsyncpa [#allocation6], 1 }

</bundles_post_ra>
